<compile_context>
chip_gen: v5e
topology: v5e:2x2
jax: 0.10.0
libtpu: 0.0.40
codegen_flags: <defaults>
</compile_context>

<pallas_src>
import functools

import jax
import jax.numpy as jnp
from jax import lax
from jax.experimental import pallas as pl
from jax.experimental.pallas import tpu as pltpu


def _dark_kernel(x_ref, dark_ref, maxc_ref, bmax_ref, *, window):
    """Per-image: pairwise channel min/max, separable window-min, rescale."""
    C, H, W = x_ref.shape
    pad = window // 2
    BIG = 1e30  # Python float literal -> no captured constant

    # ---- channel min / max (pairwise, stays on the VPU) ---------------------
    min_c = x_ref[0]
    max_c = x_ref[0]
    for c in range(1, C):
        xc = x_ref[c]
        min_c = jnp.minimum(min_c, xc)
        max_c = jnp.maximum(max_c, xc)

    # static index maps for the validity masks (built once, compile-time shifts)
    col = lax.broadcasted_iota(jnp.int32, (H, W), 1)
    row = lax.broadcasted_iota(jnp.int32, (H, W), 0)

    # ---- pass 1: 1 x window min along W (lane rolls) -------------------------
    # roll by +s delivers the value at column (c - s): valid iff col >= s
    # roll by W-s (== -s) delivers column (c + s):      valid iff col <= W-1-s
    row_min = min_c
    for s in range(1, pad + 1):
        left = pltpu.roll(min_c, shift=s, axis=1)
        row_min = jnp.minimum(row_min, jnp.where(col >= s, left, BIG))
        right = pltpu.roll(min_c, shift=W - s, axis=1)
        row_min = jnp.minimum(row_min, jnp.where(col <= W - 1 - s, right, BIG))

    # ---- pass 2: window x 1 min along H (sublane rolls) -----------------------
    dark = row_min
    for s in range(1, pad + 1):
        up = pltpu.roll(row_min, shift=s, axis=0)
        dark = jnp.minimum(dark, jnp.where(row >= s, up, BIG))
        down = pltpu.roll(row_min, shift=H - s, axis=0)
        dark = jnp.minimum(dark, jnp.where(row <= H - 1 - s, down, BIG))

    # rescale once on the (H, W) results; (x+1)/2*255 is monotone, so it
    # commutes exactly with min / max.
    dark = (dark + 1.0) * 0.5 * 255.0
    maxc = (max_c + 1.0) * 0.5 * 255.0

    dark_ref[...] = dark
    maxc_ref[...] = maxc
    # per-image max(dark): lane reduce then sublane reduce -> (1, 1)
    bmax_ref[...] = jnp.max(jnp.max(dark, axis=1, keepdims=True),
                            axis=0, keepdims=True)


def _a_candidate_kernel(thr_ref, dark_ref, maxc_ref, acand_ref):
    """Per-image candidate for A: max over masked per-pixel channel max."""
    thr = thr_ref[0]
    cand = jnp.where(dark_ref[...] >= thr, maxc_ref[...], 0.0)
    acand_ref[...] = jnp.max(jnp.max(cand, axis=1, keepdims=True),
                             axis=0, keepdims=True)


def _normalize_kernel(inv_ref, dark_ref, t_ref):
    """t = dark * (1/A) — trivial mem-bound normalize (output aliases dark)."""
    t_ref[...] = dark_ref[...] * inv_ref[0]


@functools.partial(jax.jit, static_argnames=("window",))
def dark_channel_prior(x, window=5):
    """Pallas implementation of DarkChannelPrior.forward. x: (B, C, H, W) f32."""
    B, C, H, W = x.shape

    # vmem budget derived from the per-step footprint (x + dark + maxc, double
    # buffered + temporaries), capped for v7x's 64 MiB physical VMEM.
    block_bytes = (C + 2) * H * W * 4
    vmem_limit = int(min(48 * 1024 * 1024, max(32 * 1024 * 1024, 6 * block_bytes)))

    params = pltpu.CompilerParams(
        dimension_semantics=("parallel",),          # megacore sharding over batch
        vmem_limit_bytes=vmem_limit,
    )

    # ---- phase 1: dark channel, per-pixel channel max, per-image dark max ---
    dark, maxc, bmax = pl.pallas_call(
        functools.partial(_dark_kernel, window=window),
        grid=(B,),
        in_specs=[
            pl.BlockSpec((None, C, H, W), lambda b: (b, 0, 0, 0)),   # x, one image/step
        ],
        out_specs=[
            pl.BlockSpec((None, H, W), lambda b: (b, 0, 0)),         # dark
            pl.BlockSpec((None, H, W), lambda b: (b, 0, 0)),         # per-pixel channel max
            pl.BlockSpec((None, 1, 1), lambda b: (b, 0, 0)),         # per-image max(dark)
        ],
        out_shape=[
            jax.ShapeDtypeStruct((B, H, W), jnp.float32),
            jax.ShapeDtypeStruct((B, H, W), jnp.float32),
            jax.ShapeDtypeStruct((B, 1, 1), jnp.float32),
        ],
        compiler_params=params,
    )(x)

    # tiny global scalar combines (B values each) in plain JAX
    dc_max = jnp.max(bmax)
    thr = jnp.reshape(0.95 * dc_max, (1,))

    # ---- phase 2: per-image A candidates under the global threshold ---------
    acand = pl.pallas_call(
        _a_candidate_kernel,
        grid=(B,),
        in_specs=[
            pl.BlockSpec(memory_space=pltpu.MemorySpace.SMEM),       # threshold scalar
            pl.BlockSpec((None, H, W), lambda b: (b, 0, 0)),         # dark
            pl.BlockSpec((None, H, W), lambda b: (b, 0, 0)),         # channel max
        ],
        out_specs=pl.BlockSpec((None, 1, 1), lambda b: (b, 0, 0)),
        out_shape=jax.ShapeDtypeStruct((B, 1, 1), jnp.float32),
        compiler_params=params,
    )(thr, dark, maxc)

    A = jnp.max(acand)
    inv_a = jnp.reshape(1.0 / A, (1,))               # exact scalar reciprocal, once

    # ---- phase 3: normalize t = dark * (1/A), written in place over dark ----
    t = pl.pallas_call(
        _normalize_kernel,
        grid=(B,),
        in_specs=[
            pl.BlockSpec(memory_space=pltpu.MemorySpace.SMEM),       # 1/A scalar
            pl.BlockSpec((None, H, W), lambda b: (b, 0, 0)),         # dark
        ],
        out_specs=pl.BlockSpec((None, H, W), lambda b: (b, 0, 0)),
        out_shape=jax.ShapeDtypeStruct((B, H, W), jnp.float32),
        input_output_aliases={1: 0},                 # reuse the dark HBM buffer
        compiler_params=params,
    )(inv_a, dark)

    return t.reshape(B, 1, H, W)


def _reference(x, window=5):
    """Pure-JAX reference mirroring the PyTorch module."""
    pad = window // 2
    xs = (x + 1.0) / 2.0 * 255.0
    min_rgb = jnp.min(xs, axis=1, keepdims=True)
    pooled = lax.reduce_window(
        1.0 - min_rgb, -jnp.inf, lax.max,
        (1, 1, window, window), (1, 1, 1, 1),
        [(0, 0), (0, 0), (pad, pad), (pad, pad)])
    dark = 1.0 - pooled
    dc_max = jnp.max(dark)
    mask = jnp.broadcast_to(dark, xs.shape) >= 0.95 * dc_max
    A = jnp.max(jnp.where(mask, xs, 0.0))
    return dark / A


if __name__ == "__main__":
    key = jax.random.PRNGKey(0)
    # the module's darkchannel3 / A[mask] = x[mask] logic implies 3 input channels
    B, C, H, W = 2, 3, 16, 16
    x = jax.random.uniform(key, (B, C, H, W), jnp.float32, minval=-1.0, maxval=1.0)

    t = dark_channel_prior(x)
    t = jax.block_until_ready(t)

    t_ref = _reference(x)
    assert t.shape == (B, 1, H, W)
    assert jnp.allclose(t, t_ref, rtol=1e-5, atol=1e-5), "mismatch vs reference"

    print("KERNEL_OK")
</pallas_src>

<mosaic_0001>
module attributes {stable_mosaic.version = 11 : i64} {
  func.func @_a_candidate_kernel(%arg0: i32, %arg1: memref<1xf32, #tpu.memory_space<smem>>, %arg2: memref<1x16x16xf32, #tpu.memory_space<vmem>>, %arg3: memref<1x16x16xf32, #tpu.memory_space<vmem>>, %arg4: memref<1x1x1xf32, #tpu.memory_space<vmem>>) attributes {dimension_semantics = [#tpu.dimension_semantics<parallel>], iteration_bounds = array<i64: 2>, scalar_prefetch = 0 : i64, scratch_operands = 0 : i64, tpu.core_type = #tpu.core_type<tc>, window_params = [{transform_indices = @transform_0, window_bounds = array<i64: 1>}, {transform_indices = @transform_1, window_bounds = array<i64: 1, 16, 16>}, {transform_indices = @transform_2, window_bounds = array<i64: 1, 16, 16>}, {transform_indices = @transform_3, window_bounds = array<i64: 1, 1, 1>}]} {
    %c0 = arith.constant 0 : index
    %0 = memref.load %arg1[%c0] : memref<1xf32, #tpu.memory_space<smem>>
    %c0_0 = arith.constant 0 : index
    %c0_1 = arith.constant 0 : index
    %c0_2 = arith.constant 0 : index
    %1 = vector.load %arg2[%c0_0, %c0_1, %c0_2] : memref<1x16x16xf32, #tpu.memory_space<vmem>>, vector<1x16x16xf32>
    %2 = vector.shape_cast %1 : vector<1x16x16xf32> to vector<16x16xf32>
    %3 = vector.broadcast %0 : f32 to vector<16x16xf32>
    %4 = arith.cmpf oge, %2, %3 : vector<16x16xf32>
    %c0_3 = arith.constant 0 : index
    %c0_4 = arith.constant 0 : index
    %c0_5 = arith.constant 0 : index
    %5 = vector.load %arg3[%c0_3, %c0_4, %c0_5] : memref<1x16x16xf32, #tpu.memory_space<vmem>>, vector<1x16x16xf32>
    %6 = vector.shape_cast %5 : vector<1x16x16xf32> to vector<16x16xf32>
    %cst = arith.constant 0.000000e+00 : f32
    %7 = vector.broadcast %cst : f32 to vector<16x16xf32>
    %8 = arith.select %4, %6, %7 : vector<16x16xi1>, vector<16x16xf32>
    %cst_6 = arith.constant dense<0xFF800000> : vector<16xf32>
    %9 = vector.multi_reduction <maximumf>, %8, %cst_6 [1] : vector<16x16xf32> to vector<16xf32>
    %10 = vector.shape_cast %9 : vector<16xf32> to vector<16x1xf32>
    %cst_7 = arith.constant dense<0xFF800000> : vector<1xf32>
    %11 = vector.multi_reduction <maximumf>, %10, %cst_7 [0] : vector<16x1xf32> to vector<1xf32>
    %12 = vector.shape_cast %11 : vector<1xf32> to vector<1x1xf32>
    %c0_8 = arith.constant 0 : index
    %c0_9 = arith.constant 0 : index
    %c0_10 = arith.constant 0 : index
    %13 = vector.load %arg4[%c0_8, %c0_9, %c0_10] : memref<1x1x1xf32, #tpu.memory_space<vmem>>, vector<1x1x1xf32>
    %14 = vector.shape_cast %13 : vector<1x1x1xf32> to vector<1x1xf32>
    %15 = vector.shape_cast %12 : vector<1x1xf32> to vector<1x1x1xf32>
    tpu.vector_store %arg4[%c0_8, %c0_9, %c0_10], %15 {strides = array<i32>} : memref<1x1x1xf32, #tpu.memory_space<vmem>>, vector<1x1x1xf32>,
    return
  }
  func.func @transform_0(%arg0: i32) -> i32 {
    %c0_i32 = arith.constant 0 : i32
    %c0_i32_0 = arith.constant 0 : i32
    return %c0_i32 : i32
  }
  func.func @transform_1(%arg0: i32) -> (i32, i32, i32) {
    %c0_i32 = arith.constant 0 : i32
    %c0_i32_0 = arith.constant 0 : i32
    %c0_i32_1 = arith.constant 0 : i32
    return %arg0, %c0_i32, %c0_i32_0 : i32, i32, i32
  }
  func.func @transform_2(%arg0: i32) -> (i32, i32, i32) {
    %c0_i32 = arith.constant 0 : i32
    %c0_i32_0 = arith.constant 0 : i32
    %c0_i32_1 = arith.constant 0 : i32
    return %arg0, %c0_i32, %c0_i32_0 : i32, i32, i32
  }
  func.func @transform_3(%arg0: i32) -> (i32, i32, i32) {
    %c0_i32 = arith.constant 0 : i32
    %c0_i32_0 = arith.constant 0 : i32
    %c0_i32_1 = arith.constant 0 : i32
    return %arg0, %c0_i32, %c0_i32_0 : i32, i32, i32
  }
}

module attributes {stable_mosaic.version = 11 : i64} {
  func.func @_normalize_kernel(%arg0: i32, %arg1: memref<1xf32, #tpu.memory_space<smem>>, %arg2: memref<1x16x16xf32, #tpu.memory_space<vmem>>, %arg3: memref<1x16x16xf32, #tpu.memory_space<vmem>>) attributes {dimension_semantics = [#tpu.dimension_semantics<parallel>], iteration_bounds = array<i64: 2>, scalar_prefetch = 0 : i64, scratch_operands = 0 : i64, tpu.core_type = #tpu.core_type<tc>, window_params = [{transform_indices = @transform_0, window_bounds = array<i64: 1>}, {transform_indices = @transform_1, window_bounds = array<i64: 1, 16, 16>}, {transform_indices = @transform_2, window_bounds = array<i64: 1, 16, 16>}]} {
    %c0 = arith.constant 0 : index
    %c0_0 = arith.constant 0 : index
    %c0_1 = arith.constant 0 : index
    %0 = vector.load %arg2[%c0, %c0_0, %c0_1] : memref<1x16x16xf32, #tpu.memory_space<vmem>>, vector<1x16x16xf32>
    %1 = vector.shape_cast %0 : vector<1x16x16xf32> to vector<16x16xf32>
    %c0_2 = arith.constant 0 : index
    %2 = memref.load %arg1[%c0_2] : memref<1xf32, #tpu.memory_space<smem>>
    %3 = vector.broadcast %2 : f32 to vector<16x16xf32>
    %4 = arith.mulf %1, %3 : vector<16x16xf32>
    %c0_3 = arith.constant 0 : index
    %c0_4 = arith.constant 0 : index
    %c0_5 = arith.constant 0 : index
    %5 = vector.load %arg3[%c0_3, %c0_4, %c0_5] : memref<1x16x16xf32, #tpu.memory_space<vmem>>, vector<1x16x16xf32>
    %6 = vector.shape_cast %5 : vector<1x16x16xf32> to vector<16x16xf32>
    %7 = vector.shape_cast %4 : vector<16x16xf32> to vector<1x16x16xf32>
    tpu.vector_store %arg3[%c0_3, %c0_4, %c0_5], %7 {strides = array<i32>} : memref<1x16x16xf32, #tpu.memory_space<vmem>>, vector<1x16x16xf32>,
    return
  }
  func.func @transform_0(%arg0: i32) -> i32 {
    %c0_i32 = arith.constant 0 : i32
    %c0_i32_0 = arith.constant 0 : i32
    return %c0_i32 : i32
  }
  func.func @transform_1(%arg0: i32) -> (i32, i32, i32) {
    %c0_i32 = arith.constant 0 : i32
    %c0_i32_0 = arith.constant 0 : i32
    %c0_i32_1 = arith.constant 0 : i32
    return %arg0, %c0_i32, %c0_i32_0 : i32, i32, i32
  }
  func.func @transform_2(%arg0: i32) -> (i32, i32, i32) {
    %c0_i32 = arith.constant 0 : i32
    %c0_i32_0 = arith.constant 0 : i32
    %c0_i32_1 = arith.constant 0 : i32
    return %arg0, %c0_i32, %c0_i32_0 : i32, i32, i32
  }
}

module attributes {stable_mosaic.version = 11 : i64} {
  func.func @_dark_kernel(%arg0: i32, %arg1: memref<1x3x16x16xf32, #tpu.memory_space<vmem>>, %arg2: memref<1x16x16xf32, #tpu.memory_space<vmem>>, %arg3: memref<1x16x16xf32, #tpu.memory_space<vmem>>, %arg4: memref<1x1x1xf32, #tpu.memory_space<vmem>>) attributes {dimension_semantics = [#tpu.dimension_semantics<parallel>], iteration_bounds = array<i64: 2>, scalar_prefetch = 0 : i64, scratch_operands = 0 : i64, tpu.core_type = #tpu.core_type<tc>, window_params = [{transform_indices = @transform_0, window_bounds = array<i64: 1, 3, 16, 16>}, {transform_indices = @transform_1, window_bounds = array<i64: 1, 16, 16>}, {transform_indices = @transform_2, window_bounds = array<i64: 1, 16, 16>}, {transform_indices = @transform_3, window_bounds = array<i64: 1, 1, 1>}]} {
    %c0 = arith.constant 0 : index
    %c0_0 = arith.constant 0 : index
    %c0_1 = arith.constant 0 : index
    %c0_2 = arith.constant 0 : index
    %0 = vector.load %arg1[%c0, %c0_0, %c0_1, %c0_2] : memref<1x3x16x16xf32, #tpu.memory_space<vmem>>, vector<1x1x16x16xf32>
    %1 = vector.shape_cast %0 : vector<1x1x16x16xf32> to vector<16x16xf32>
    %c0_3 = arith.constant 0 : index
    %c0_4 = arith.constant 0 : index
    %c0_5 = arith.constant 0 : index
    %c0_6 = arith.constant 0 : index
    %2 = vector.load %arg1[%c0_3, %c0_4, %c0_5, %c0_6] : memref<1x3x16x16xf32, #tpu.memory_space<vmem>>, vector<1x1x16x16xf32>
    %3 = vector.shape_cast %2 : vector<1x1x16x16xf32> to vector<16x16xf32>
    %c0_7 = arith.constant 0 : index
    %c1 = arith.constant 1 : index
    %c0_8 = arith.constant 0 : index
    %c0_9 = arith.constant 0 : index
    %4 = vector.load %arg1[%c0_7, %c1, %c0_8, %c0_9] : memref<1x3x16x16xf32, #tpu.memory_space<vmem>>, vector<1x1x16x16xf32>
    %5 = vector.shape_cast %4 : vector<1x1x16x16xf32> to vector<16x16xf32>
    %6 = arith.minimumf %1, %5 : vector<16x16xf32>
    %7 = arith.maximumf %3, %5 : vector<16x16xf32>
    %c0_10 = arith.constant 0 : index
    %c2 = arith.constant 2 : index
    %c0_11 = arith.constant 0 : index
    %c0_12 = arith.constant 0 : index
    %8 = vector.load %arg1[%c0_10, %c2, %c0_11, %c0_12] : memref<1x3x16x16xf32, #tpu.memory_space<vmem>>, vector<1x1x16x16xf32>
    %9 = vector.shape_cast %8 : vector<1x1x16x16xf32> to vector<16x16xf32>
    %10 = arith.minimumf %6, %9 : vector<16x16xf32>
    %11 = arith.maximumf %7, %9 : vector<16x16xf32>
    %12 = tpu.iota {dimensions = array<i32: 1>} : vector<16x16xi32>
    %13 = tpu.iota {dimensions = array<i32: 0>} : vector<16x16xi32>
    %c1_i32 = arith.constant 1 : i32
    %14 = tpu.dynamic_rotate %10 by %c1_i32 dim 1 : vector<16x16xf32>, i32 -> vector<16x16xf32>
    %c1_i32_13 = arith.constant 1 : i32
    %15 = vector.broadcast %c1_i32_13 : i32 to vector<16x16xi32>
    %16 = arith.cmpi sge, %12, %15 : vector<16x16xi32>
    %cst = arith.constant 1.000000e+30 : f32
    %17 = vector.broadcast %cst : f32 to vector<16x16xf32>
    %18 = arith.select %16, %14, %17 : vector<16x16xi1>, vector<16x16xf32>
    %19 = arith.minimumf %10, %18 : vector<16x16xf32>
    %c15_i32 = arith.constant 15 : i32
    %20 = tpu.dynamic_rotate %10 by %c15_i32 dim 1 : vector<16x16xf32>, i32 -> vector<16x16xf32>
    %c14_i32 = arith.constant 14 : i32
    %21 = vector.broadcast %c14_i32 : i32 to vector<16x16xi32>
    %22 = arith.cmpi sle, %12, %21 : vector<16x16xi32>
    %cst_14 = arith.constant 1.000000e+30 : f32
    %23 = vector.broadcast %cst_14 : f32 to vector<16x16xf32>
    %24 = arith.select %22, %20, %23 : vector<16x16xi1>, vector<16x16xf32>
    %25 = arith.minimumf %19, %24 : vector<16x16xf32>
    %c2_i32 = arith.constant 2 : i32
    %26 = tpu.dynamic_rotate %10 by %c2_i32 dim 1 : vector<16x16xf32>, i32 -> vector<16x16xf32>
    %c2_i32_15 = arith.constant 2 : i32
    %27 = vector.broadcast %c2_i32_15 : i32 to vector<16x16xi32>
    %28 = arith.cmpi sge, %12, %27 : vector<16x16xi32>
    %cst_16 = arith.constant 1.000000e+30 : f32
    %29 = vector.broadcast %cst_16 : f32 to vector<16x16xf32>
    %30 = arith.select %28, %26, %29 : vector<16x16xi1>, vector<16x16xf32>
    %31 = arith.minimumf %25, %30 : vector<16x16xf32>
    %c14_i32_17 = arith.constant 14 : i32
    %32 = tpu.dynamic_rotate %10 by %c14_i32_17 dim 1 : vector<16x16xf32>, i32 -> vector<16x16xf32>
    %c13_i32 = arith.constant 13 : i32
    %33 = vector.broadcast %c13_i32 : i32 to vector<16x16xi32>
    %34 = arith.cmpi sle, %12, %33 : vector<16x16xi32>
    %cst_18 = arith.constant 1.000000e+30 : f32
    %35 = vector.broadcast %cst_18 : f32 to vector<16x16xf32>
    %36 = arith.select %34, %32, %35 : vector<16x16xi1>, vector<16x16xf32>
    %37 = arith.minimumf %31, %36 : vector<16x16xf32>
    %c1_i32_19 = arith.constant 1 : i32
    %38 = tpu.dynamic_rotate %37 by %c1_i32_19 dim 0 : vector<16x16xf32>, i32 -> vector<16x16xf32>
    %c1_i32_20 = arith.constant 1 : i32
    %39 = vector.broadcast %c1_i32_20 : i32 to vector<16x16xi32>
    %40 = arith.cmpi sge, %13, %39 : vector<16x16xi32>
    %cst_21 = arith.constant 1.000000e+30 : f32
    %41 = vector.broadcast %cst_21 : f32 to vector<16x16xf32>
    %42 = arith.select %40, %38, %41 : vector<16x16xi1>, vector<16x16xf32>
    %43 = arith.minimumf %37, %42 : vector<16x16xf32>
    %c15_i32_22 = arith.constant 15 : i32
    %44 = tpu.dynamic_rotate %37 by %c15_i32_22 dim 0 : vector<16x16xf32>, i32 -> vector<16x16xf32>
    %c14_i32_23 = arith.constant 14 : i32
    %45 = vector.broadcast %c14_i32_23 : i32 to vector<16x16xi32>
    %46 = arith.cmpi sle, %13, %45 : vector<16x16xi32>
    %cst_24 = arith.constant 1.000000e+30 : f32
    %47 = vector.broadcast %cst_24 : f32 to vector<16x16xf32>
    %48 = arith.select %46, %44, %47 : vector<16x16xi1>, vector<16x16xf32>
    %49 = arith.minimumf %43, %48 : vector<16x16xf32>
    %c2_i32_25 = arith.constant 2 : i32
    %50 = tpu.dynamic_rotate %37 by %c2_i32_25 dim 0 : vector<16x16xf32>, i32 -> vector<16x16xf32>
    %c2_i32_26 = arith.constant 2 : i32
    %51 = vector.broadcast %c2_i32_26 : i32 to vector<16x16xi32>
    %52 = arith.cmpi sge, %13, %51 : vector<16x16xi32>
    %cst_27 = arith.constant 1.000000e+30 : f32
    %53 = vector.broadcast %cst_27 : f32 to vector<16x16xf32>
    %54 = arith.select %52, %50, %53 : vector<16x16xi1>, vector<16x16xf32>
    %55 = arith.minimumf %49, %54 : vector<16x16xf32>
    %c14_i32_28 = arith.constant 14 : i32
    %56 = tpu.dynamic_rotate %37 by %c14_i32_28 dim 0 : vector<16x16xf32>, i32 -> vector<16x16xf32>
    %c13_i32_29 = arith.constant 13 : i32
    %57 = vector.broadcast %c13_i32_29 : i32 to vector<16x16xi32>
    %58 = arith.cmpi sle, %13, %57 : vector<16x16xi32>
    %cst_30 = arith.constant 1.000000e+30 : f32
    %59 = vector.broadcast %cst_30 : f32 to vector<16x16xf32>
    %60 = arith.select %58, %56, %59 : vector<16x16xi1>, vector<16x16xf32>
    %61 = arith.minimumf %55, %60 : vector<16x16xf32>
    %cst_31 = arith.constant 1.000000e+00 : f32
    %62 = vector.broadcast %cst_31 : f32 to vector<16x16xf32>
    %63 = arith.addf %61, %62 : vector<16x16xf32>
    %cst_32 = arith.constant 5.000000e-01 : f32
    %64 = vector.broadcast %cst_32 : f32 to vector<16x16xf32>
    %65 = arith.mulf %63, %64 : vector<16x16xf32>
    %cst_33 = arith.constant 2.550000e+02 : f32
    %66 = vector.broadcast %cst_33 : f32 to vector<16x16xf32>
    %67 = arith.mulf %65, %66 : vector<16x16xf32>
    %cst_34 = arith.constant 1.000000e+00 : f32
    %68 = vector.broadcast %cst_34 : f32 to vector<16x16xf32>
    %69 = arith.addf %11, %68 : vector<16x16xf32>
    %cst_35 = arith.constant 5.000000e-01 : f32
    %70 = vector.broadcast %cst_35 : f32 to vector<16x16xf32>
    %71 = arith.mulf %69, %70 : vector<16x16xf32>
    %cst_36 = arith.constant 2.550000e+02 : f32
    %72 = vector.broadcast %cst_36 : f32 to vector<16x16xf32>
    %73 = arith.mulf %71, %72 : vector<16x16xf32>
    %c0_37 = arith.constant 0 : index
    %c0_38 = arith.constant 0 : index
    %c0_39 = arith.constant 0 : index
    %74 = vector.load %arg2[%c0_37, %c0_38, %c0_39] : memref<1x16x16xf32, #tpu.memory_space<vmem>>, vector<1x16x16xf32>
    %75 = vector.shape_cast %74 : vector<1x16x16xf32> to vector<16x16xf32>
    %76 = vector.shape_cast %67 : vector<16x16xf32> to vector<1x16x16xf32>
    tpu.vector_store %arg2[%c0_37, %c0_38, %c0_39], %76 {strides = array<i32>} : memref<1x16x16xf32, #tpu.memory_space<vmem>>, vector<1x16x16xf32>,
    %c0_40 = arith.constant 0 : index
    %c0_41 = arith.constant 0 : index
    %c0_42 = arith.constant 0 : index
    %77 = vector.load %arg3[%c0_40, %c0_41, %c0_42] : memref<1x16x16xf32, #tpu.memory_space<vmem>>, vector<1x16x16xf32>
    %78 = vector.shape_cast %77 : vector<1x16x16xf32> to vector<16x16xf32>
    %79 = vector.shape_cast %73 : vector<16x16xf32> to vector<1x16x16xf32>
    tpu.vector_store %arg3[%c0_40, %c0_41, %c0_42], %79 {strides = array<i32>} : memref<1x16x16xf32, #tpu.memory_space<vmem>>, vector<1x16x16xf32>,
    %cst_43 = arith.constant dense<0xFF800000> : vector<16xf32>
    %80 = vector.multi_reduction <maximumf>, %67, %cst_43 [1] : vector<16x16xf32> to vector<16xf32>
    %81 = vector.shape_cast %80 : vector<16xf32> to vector<16x1xf32>
    %cst_44 = arith.constant dense<0xFF800000> : vector<1xf32>
    %82 = vector.multi_reduction <maximumf>, %81, %cst_44 [0] : vector<16x1xf32> to vector<1xf32>
    %83 = vector.shape_cast %82 : vector<1xf32> to vector<1x1xf32>
    %c0_45 = arith.constant 0 : index
    %c0_46 = arith.constant 0 : index
    %c0_47 = arith.constant 0 : index
    %84 = vector.load %arg4[%c0_45, %c0_46, %c0_47] : memref<1x1x1xf32, #tpu.memory_space<vmem>>, vector<1x1x1xf32>
    %85 = vector.shape_cast %84 : vector<1x1x1xf32> to vector<1x1xf32>
    %86 = vector.shape_cast %83 : vector<1x1xf32> to vector<1x1x1xf32>
    tpu.vector_store %arg4[%c0_45, %c0_46, %c0_47], %86 {strides = array<i32>} : memref<1x1x1xf32, #tpu.memory_space<vmem>>, vector<1x1x1xf32>,
    return
  }
  func.func @transform_0(%arg0: i32) -> (i32, i32, i32, i32) {
    %c0_i32 = arith.constant 0 : i32
    %c0_i32_0 = arith.constant 0 : i32
    %c0_i32_1 = arith.constant 0 : i32
    %c0_i32_2 = arith.constant 0 : i32
    return %arg0, %c0_i32, %c0_i32_0, %c0_i32_1 : i32, i32, i32, i32
  }
  func.func @transform_1(%arg0: i32) -> (i32, i32, i32) {
    %c0_i32 = arith.constant 0 : i32
    %c0_i32_0 = arith.constant 0 : i32
    %c0_i32_1 = arith.constant 0 : i32
    return %arg0, %c0_i32, %c0_i32_0 : i32, i32, i32
  }
  func.func @transform_2(%arg0: i32) -> (i32, i32, i32) {
    %c0_i32 = arith.constant 0 : i32
    %c0_i32_0 = arith.constant 0 : i32
    %c0_i32_1 = arith.constant 0 : i32
    return %arg0, %c0_i32, %c0_i32_0 : i32, i32, i32
  }
  func.func @transform_3(%arg0: i32) -> (i32, i32, i32) {
    %c0_i32 = arith.constant 0 : i32
    %c0_i32_0 = arith.constant 0 : i32
    %c0_i32_1 = arith.constant 0 : i32
    return %arg0, %c0_i32, %c0_i32_0 : i32, i32, i32
  }
}

</mosaic_0001>

<bundles_post_ra>
// kernel: dark_channel_prior.5
= control target key start
LH: loop header
LB: loop body
LE: loop exit
PB: predicated region body
PF: predicated region fallthrough
CT: control target
= control target key end

     0   :  { %s234_s11 = smov 0   ;;  %s262_s0 = inlined_call_operand.<no memory space> [shape: f32[1], index: 0, kind: input, shape index: {}]   ;;  %s263_s1 = inlined_call_operand.vmem [shape: f32[2,16,16], index: 1, kind: input, shape index: {}, may-alias: {1,2}]   ;;  %s264_s2 = inlined_call_operand.vmem [shape: f32[2,16,16], index: 2, kind: output, shape index: {}, may-alias: {1,2}]  }
   0x1   :  { %7 = sst [smem:[#allocation2]] %s262_s0 }
   0x2 LB: > { %s209_s12 = sadd.s32 4294967295, %s236_s11   ;;  %p213_p0 = scmp.ge.s32.totalorder %s236_s11, 1  ;;  %s236_s11 = sphi %s234_s11, %s13_s11  }
   0x3   : > { %p113_p1 = scmp.lt.s32.totalorder %s236_s11, 3 }
   0x5   : > { %p114_p2 = pnand %p213_p0, %p113_p1 }
   0x6   : > { %p135_p3 = scmp.lt.s32.totalorder (!%p114_p2), %s209_s12, 1  ;;  %s147_s13 = sld [smem:[#allocation2]] (!%p114_p2) }
   0x7   : > { %117 = sbr.rel (%p114_p2) target bundleno = 20 (0x14), region = 28 }
   0xc   : > { %s266_s12 = smov (!%p135_p3, %s209_s12), 1  ;;  %v148_v2 = vstv %s147_s13  ;;  %vm151_vm0 = vcmask 130048  }
   0xd   : > { %s220_s14 = sshll.u32 %s266_s12, 4 }
   0xe   : > { %s139_s17 = scalar_lea.vmem %s263_s1, %s220_s14  ;;  %s144_s0 = scalar_lea.vmem %s264_s2, %s220_s14 }
   0xf   : > { %v145_v0 = vld [vmem:[%s139_s17] sm:$0xff]  ;;  %v146_v1 = vld [vmem:[%s139_s17 + $0x8] sm:$0xff] }
  0x10   : > { %v149_v3 = vmul.f32 %v148_v2, %v145_v0  ;;  %v150_v4 = vmul.f32 %v148_v2, %v146_v1 }
  0x12   : > { %152 = vst.msk [vmem:[%s144_s0] sm:$0xff] %vm151_vm0, %v149_v3 }
  0x13   : > { %153 = vst.msk [vmem:[%s144_s0 + $0x8] sm:$0xff] %vm151_vm0, %v150_v4 }
  0x14 PF: > { %s13_s11 = sadd.s32 1, %s236_s11  }
  0x15   : > { %p10_p4 = scmp.ge.s32.totalorder %s13_s11, 4  }
  0x17   :  { %12 = sbr.rel (!%p10_p4) target bundleno = 2 (0x2), region = 58 }

// kernel: dark_channel_prior.4
= control target key start
LH: loop header
LB: loop body
LE: loop exit
PB: predicated region body
PF: predicated region fallthrough
CT: control target
= control target key end

     0   :  { %s325_s14 = smov 0   ;;  %s349_s0 = inlined_call_operand.<no memory space> [shape: f32[1], index: 0, kind: input, shape index: {}]   ;;  %s350_s1 = inlined_call_operand.vmem [shape: f32[2,16,16], index: 1, kind: input, shape index: {}]   ;;  %s351_s2 = inlined_call_operand.vmem [shape: f32[2,16,16], index: 2, kind: input, shape index: {}]   ;;  %s352_s3 = inlined_call_operand.vmem [shape: f32[2,1,1], index: 3, kind: output, shape index: {}]  }
   0x1   :  { %8 = sst [smem:[#allocation2]] %s349_s0 }
   0x2 LB: > { %s273_s15 = sadd.s32 4294967295, %s300_s14   ;;  %p277_p0 = scmp.ge.s32.totalorder %s300_s14, 1  ;;  %s300_s14 = sphi %s325_s14, %s14_s14  }
   0x3   : > { %p148_p1 = scmp.lt.s32.totalorder %s300_s14, 3 }
   0x5   : > { %p149_p2 = pnand %p277_p0, %p148_p1 }
   0x6   : > { %p175_p3 = scmp.lt.s32.totalorder (!%p149_p2), %s273_s15, 1  ;;  %s188_s16 = sld [smem:[#allocation2]] (!%p149_p2) }
   0x7   : > { %152 = sbr.rel (%p149_p2) target bundleno = 158 (0x9e), region = 32 }
   0xc   : > { %s354_s15 = smov (!%p175_p3, %s273_s15), 1  ;;  %v191_v1 = vstv %s188_s16  ;;  %vm198_vm0 = vcmask 130048   ;;  %vm212_vm3 = vcmask 0  }
   0xd   : > { %s284_s0 = sshll.u32 %s354_s15, 4  ;;  %s187_s25 = scalar_lea.vmem %s352_s3, %s354_s15 }
   0xe   : > { %s179_s19 = scalar_lea.vmem %s350_s1, %s284_s0  ;;  %s184_s22 = scalar_lea.vmem %s351_s2, %s284_s0 }
   0xf   : > { %v189_v0 = vld [vmem:[%s179_s19] sm:$0xff]  ;;  %v190_v3 = vld [vmem:[%s179_s19 + $0x8] sm:$0xff] }
  0x10   : > { %v194_v2 = vld [vmem:[%s184_s22] sm:$0xff]  ;;  %vm192_vm1 = vcmp.ge.f32.partialorder %v189_v0, %v191_v1  ;;  %vm193_vm2 = vcmp.ge.f32.partialorder %v190_v3, %v191_v1  ;;  %v195_v6 = vld [vmem:[%s184_s22 + $0x8] sm:$0xff] }
  0x11   : > { %v196_v4 = vsel %vm192_vm1, %v194_v2, 0.0  ;;  %v197_v7 = vsel %vm193_vm2, %v195_v6, 0.0 }
  0x12   : > { %v199_v5 = vsel %vm198_vm0, %v196_v4, -inf  ;;  %v202_v8 = vsel %vm198_vm0, %v197_v7, -inf }
  0x13   : > { %200 = vmax.xlane.f32.xlu0 %v199_v5 }
  0x1b   : > { %203 = vmax.xlane.f32.xlu0 %v202_v8 }
  0x86   : > { %v201_v9 = vpop.xlane.xlu0 %200 }
  0x8e   : > { %v204_v10 = vpop.xlane.xlu0 %203 }
  0x8f   : > { %v205_v11 = vmax.f32 %v201_v9, %v204_v10 }
  0x91   : > { %v206_v12 = vrot.slane %v205_v11, 4 }
  0x93   : > { %v207_v13 = vmax.f32 %v205_v11, %v206_v12 }
  0x95   : > { %v208_v14 = vrot.slane %v207_v13, 2 }
  0x97   : > { %v209_v15 = vmax.f32 %v207_v13, %v208_v14 }
  0x99   : > { %v210_v16 = vrot.slane %v209_v15, 1 }
  0x9b   : > { %v211_v17 = vmax.f32 %v209_v15, %v210_v16 }
  0x9d   : > { %213 = vst.msk [vmem:[%s187_s25] sm:$0x1] %vm212_vm3, %v211_v17 }
  0x9e PF: > { %s14_s14 = sadd.s32 1, %s300_s14  }
  0x9f   : > { %p11_p4 = scmp.ge.s32.totalorder %s14_s14, 4  }
  0xa1   :  { %13 = sbr.rel (!%p11_p4) target bundleno = 2 (0x2), region = 65 }

// kernel: dark_channel_prior.3
= control target key start
LH: loop header
LB: loop body
LE: loop exit
PB: predicated region body
PF: predicated region fallthrough
CT: control target
= control target key end

     0   :  { %9 = vsyncpa [#allocation3], 0  ;;  %s774_s0 = inlined_call_operand.hbm [shape: f32[2,3,16,16], index: 0, kind: input, shape index: {}]   ;;  %s775_s1 = inlined_call_operand.vmem [shape: f32[2,16,16], index: 1, kind: output, shape index: {0}]   ;;  %s776_s2 = inlined_call_operand.vmem [shape: f32[2,16,16], index: 2, kind: output, shape index: {1}]   ;;  %s777_s3 = inlined_call_operand.vmem [shape: f32[2,1,1], index: 3, kind: output, shape index: {2}]  }
   0x1   :  { %11 = vsyncpa [#allocation3 + $0x1], 0  ;;  %s654_s12 = smov 0   ;;  %s656_s13 = smov 0  }
   0x2   :  { %s658_s14 = smov 0   ;;  %s660_s15 = smov 0  }
   0x3 LB: > { %s673_s16 = sadd.s32 4294967295, %s625_s15   ;;  %s676_s17 = sadd.s32 1, %s625_s15   ;;  %s625_s15 = sphi %s660_s15, %s783_s15   ;;  %s621_s14 = sphi %s658_s14, %s782_s14   ;;  %s617_s13 = sphi %s656_s13, %s781_s13   ;;  %s613_s12 = sphi %s654_s12, %s780_s12  }
   0x4   : > { %s21_s18 = ssub.s32 %s625_s15, %s676_s17  ;;  %s24_s19 = sadd.s32 1, %s621_s14 }
   0x5   : > { %p22_p0 = scmp.eq.s32.totalorder %s21_s18, 0  ;;  %p31_p1 = scmp.ne.s32.totalorder %s621_s14, %s617_s13 }
   0x6   : > { %p32_p2 = scmp.eq.s32.totalorder %s625_s15, 0  ;;  %p37_p3 = scmp.ne.s32.totalorder %s617_s13, %s613_s12 }
   0x7   : > { %s686_s20 = scalar_select %p22_p0, %s621_s14, %s24_s19  }
   0x8   : > { %p33_p4 = por %p32_p2, %p31_p1  ;;  %p38_p5 = scmp.eq.s32.totalorder %s673_s16, 0 }
   0x9   : > { %p521_p6 = scmp.lt.s32.totalorder %s625_s15, 2  ;;  %s139_s22 = sand.u32 1, %s621_s14  }
   0xa   : > { %p690_p7 = por %p38_p5, %p37_p3  ;;  %s512_s23 = smul.u32 48, %s139_s22 }
   0xb   : > { %s513_s24 = smul.u32 48, %s625_s15  ;;  %p696_p8 = pnand %p521_p6, %p33_p4 }
   0xc   : > { %s143_s29 = scalar_lea.vmem [#allocation2], %s512_s23  ;;  %p499_p9 = scmp.ge.s32.totalorder %s625_s15, 1 }
   0xd   : > { %s148_s28 = scalar_lea.hbm %s774_s0, %s513_s24  ;;  %s151_s30 = sshll.u32 %s143_s29, 4  ;;  %s152_s30 = int_to_ptr.vmem [resolvable:$true] %s151_s30 }
   0xe   : > { %s149_s4 = sshll.u32 %s148_s28, 4  ;;  %s140_s5 = scalar_lea.sflag [#allocation3], %s139_s22  ;;  %s150_s4 = int_to_ptr.hbm [resolvable:$true] %s149_s4 }
   0xf   : > { %s561_s6 = sshra.s32 %s150_s4, 4  ;;  %p565_p11 = pneg %p696_p8  ;;  %s562_s6 = int_to_ptr.hbm [resolvable:$true] %s561_s6 }
  0x10   : > { %s563_s7 = scalar_lea.hbm %s562_s6, 48  ;;  %s568_s10 = scalar_lea.hbm %s774_s0, 96 }
  0x11   : > { %p564_p10 = scmp.ne.s32.totalorder %s562_s6, %s563_s7  ;;  %p569_p0 = scmp.lt.s32.totalorder %s562_s6, %s774_s0 }
  0x12   : > { %p570_p1 = scmp.lt.s32.totalorder %s568_s10, %s563_s7 }
  0x13   : > { %p566_p12 = pnand %p565_p11, %p564_p10 }
  0x14   : > { %p571_p2 = por %p570_p1, %p569_p0 }
  0x15   : > { %p567_p13 = pneg %p566_p12 }
  0x17   : > { %p572_p3 = pnand %p571_p2, %p567_p13 }
  0x19   : > { %575 = shalt.err (!%p572_p3)
}
  0x1a   : > { %s627_s18 = smov 128   ;;  %s628_s19 = smov 8  }
  0x1b   : > { %520 = dma.hbm_to_vmem [thread:$0]  (!%p696_p8), %s150_s4, 768, %s152_s30, %s140_s5, %s627_s18, %s627_s18, %s628_s19  }
  0x1c   : > { %p159_p4 = scmp.lt.s32.totalorder %s625_s15, 3 }
  0x1e   : > { %p160_p5 = pnand %p499_p9, %p159_p4 }
  0x1f   : > { %s165_s22 = sand.u32 (!%p160_p5), 1, %s617_s13  }
  0x20   : > { %163 = sbr.rel (%p160_p5) target bundleno = 559 (0x22f), region = 24  ;;  %s166_s24 = scalar_lea.sflag (!%p160_p5), [#allocation3], %s165_s22 }
  0x21   : > { %s514_s23 = smul.u32 (!%p160_p5), 48, %s165_s22 }
  0x23   : > { %s169_s26 = scalar_lea.vmem (!%p160_p5), [#allocation2], %s514_s23 }
  0x25   : > { %608 = dma.done.wait (%p690_p7), %s166_s24, 768  }
  0x26   : > { %610 = vsyncadd (%p690_p7), %s166_s24, 4294966528  ;;  %v214_v0 = vld [vmem:[%s169_s26] sm:$0xff]  ;;  %v504_v1 = vld [vmem:[%s169_s26 + $0x10] sm:$0xff]  ;;  %s629_s15 = smov 16   ;;  %vm235_vm0 = vcmask 1047680   ;;  %s630_s21 = smov 127   ;;  %v230_v27 = vlaneseq }
  0x27   : > { %v506_v2 = vld [vmem:[%s169_s26 + $0x20] sm:$0xff]  ;;  %v219_v3 = vmin.f32 %v214_v0, %v504_v1  ;;  %v221_v4 = vmax.f32 %v214_v0, %v504_v1  ;;  %v215_v5 = vld [vmem:[%s169_s26 + $0x8] sm:$0xff]  ;;  %v505_v6 = vld [vmem:[%s169_s26 + $0x18] sm:$0xff]  ;;  %s631_s25 = smov 113   ;;  %s632_s27 = smov 114   ;;  %vm350_vm1 = vcmask 130048  }
  0x28   : > { %v222_v7 = vmax.f32 %v215_v5, %v505_v6  ;;  %v507_v10 = vld [vmem:[%s169_s26 + $0x28] sm:$0xff]  ;;  %v220_v12 = vmin.f32 %v215_v5, %v505_v6  ;;  %s633_s28 = smov 126   ;;  %p201_p6 = scmp.lt.s32.totalorder %s673_s16, 1  ;;  %v231_v30 = vand.u32 127, %v230_v27  ;;  %v233_v43 = vshrl.u32 %v230_v27, 7 }
  0x29   : > { %v722_v8 = vmin.f32 %v219_v3, %v506_v2  ;;  %v228_v9 = vmax.f32 %v221_v4, %v506_v2  ;;  %vm368_vm14 = vcmask 0  }
  0x2a   : > { %v229_v11 = vmax.f32 %v222_v7, %v507_v10  ;;  %v227_v13 = vmin.f32 %v220_v12, %v507_v10  ;;  %s785_s16 = smov (!%p201_p6, %s673_s16), 1  ;;  %vm248_vm2 = vcmp.ge.s32.totalorder %v231_v30, 1  ;;  %vm261_vm3 = vcmp.le.s32.totalorder %v231_v30, 14 }
  0x2b   : > { %236 = vrot.lane.b32.xlu0 %v722_v8, %s629_s15  ;;  %v344_v23 = vadd.f32 1.0, %v228_v9  ;;  %s510_s29 = sshll.u32 %s785_s16, 4  ;;  %vm272_vm4 = vcmp.ge.s32.totalorder %v231_v30, 2  ;;  %vm283_vm5 = vcmp.le.s32.totalorder %v231_v30, 13  ;;  %v234_v50 = vadd.s32 8, %v233_v43  ;;  %s213_s11 = scalar_lea.vmem %s777_s3, %s785_s16 }
  0x2c   : > { %v345_v25 = vadd.f32 1.0, %v229_v11  ;;  %s210_s5 = scalar_lea.vmem %s776_s2, %s510_s29  ;;  %vm296_vm6 = vcmp.lt.s32.totalorder %v233_v43, 1  ;;  %vm307_vm7 = vcmp.lt.s32.totalorder %v233_v43, 7  ;;  %vm318_vm9 = vcmp.lt.s32.totalorder %v233_v43, 2  ;;  %s205_s8 = scalar_lea.vmem %s775_s1, %s510_s29 }
  0x2d   : > { %v346_v26 = vmul.f32 0.5, %v344_v23  ;;  %vm311_vm8 = vcmp.le.s32.totalorder %v234_v50, 14  ;;  %vm299_vm10 = vcmp.ge.s32.totalorder %v233_v43, 1  ;;  %vm329_vm11 = vcmp.lt.s32.totalorder %v233_v43, 6 }
  0x2e   : > { %v347_v28 = vmul.f32 0.5, %v345_v25  ;;  %vm333_vm12 = vcmp.le.s32.totalorder %v234_v50, 13  ;;  %vm321_vm13 = vcmp.ge.s32.totalorder %v233_v43, 2 }
  0x2f   : > { %v348_v29 = vmul.f32 255.0, %v346_v26 }
  0x30   : > { %v349_v32 = vmul.f32 255.0, %v347_v28 }
  0x31   : > { %353 = vst.msk [vmem:[%s210_s5] sm:$0xff] %vm350_vm1, %v348_v29 }
  0x32   : > { %354 = vst.msk [vmem:[%s210_s5 + $0x8] sm:$0xff] %vm350_vm1, %v349_v32 }
  0x33   : > { %239 = vrot.lane.b32.xlu0 %v227_v13, %s629_s15 }
  0x9d   : > { %v237_v14 = vpop.permute.xlu0 %236 }
  0x9e   : > { %v238_v15 = vsel %vm235_vm0, %v237_v14, %v722_v8 }
  0x9f   : > { %242 = vrot.lane.b32.xlu1 %v238_v15, %s629_s15 }
  0xa5   : > { %v240_v16 = vpop.permute.xlu0 %239 }
  0xa6   : > { %v241_v17 = vsel %vm235_vm0, %v240_v16, %v227_v13 }
  0xa7   : > { %244 = vrot.lane.b32.xlu1 %v241_v17, %s629_s15 }
 0x111   : > { %v243_v18 = vpop.permute.xlu1 %242 }
 0x112   : > { %v246_v19 = vsel %vm235_vm0, %v243_v18, %v722_v8 }
 0x113   : > { %262 = vrot.lane.b32.xlu0 %v246_v19, %s630_s21  ;;  %251 = vrot.lane.b32.xlu2 %v246_v19, %s631_s25 }
 0x119   : > { %v245_v20 = vpop.permute.xlu1 %244 }
 0x11a   : > { %v247_v21 = vsel %vm235_vm0, %v245_v20, %v227_v13 }
 0x11b   : > { %275 = vrot.lane.b32.xlu0 %v247_v21, %s632_s27  ;;  %264 = vrot.lane.b32.xlu1 %v247_v21, %s630_s21 }
 0x11c   : > { %253 = vrot.lane.b32.xlu2 %v247_v21, %s631_s25 }
 0x123   : > { %284 = vrot.lane.b32.xlu1 %v246_v19, %s633_s28 }
 0x124   : > { %273 = vrot.lane.b32.xlu2 %v246_v19, %s632_s27 }
 0x12c   : > { %286 = vrot.lane.b32.xlu2 %v247_v21, %s633_s28 }
 0x16d   : > { %v252_v22 = vpop.permute.xlu2 %251 }
 0x16e   : > { %v257_v35 = vsel %vm248_vm2, %v252_v22, 1e+30 }
 0x16f   : > { %v259_v41 = vmin.f32 %v722_v8, %v257_v35 }
 0x176   : > { %v254_v24 = vpop.permute.xlu2 %253 }
 0x177   : > { %v258_v34 = vsel %vm248_vm2, %v254_v24, 1e+30 }
 0x178   : > { %v260_v36 = vmin.f32 %v227_v13, %v258_v34 }
 0x17e   : > { %v274_v33 = vpop.permute.xlu2 %273 }
 0x17f   : > { %v279_v48 = vsel %vm272_vm4, %v274_v33, 1e+30 }
 0x185   : > { %v263_v31 = vpop.permute.xlu0 %262 }
 0x186   : > { %v268_v39 = vsel %vm261_vm3, %v263_v31, 1e+30  ;;  %v287_v45 = vpop.permute.xlu2 %286 }
 0x187   : > { %v270_v46 = vmin.f32 %v259_v41, %v268_v39  ;;  %v291_v49 = vsel %vm283_vm5, %v287_v45, 1e+30 }
 0x189   : > { %v281_v53 = vmin.f32 %v270_v46, %v279_v48 }
 0x18d   : > { %v265_v37 = vpop.permute.xlu1 %264  ;;  %v276_v38 = vpop.permute.xlu0 %275 }
 0x18e   : > { %v269_v40 = vsel %vm261_vm3, %v265_v37, 1e+30  ;;  %v280_v44 = vsel %vm272_vm4, %v276_v38, 1e+30 }
 0x18f   : > { %v271_v42 = vmin.f32 %v260_v36, %v269_v40 }
 0x191   : > { %v282_v47 = vmin.f32 %v271_v42, %v280_v44 }
 0x193   : > { %v293_v51 = vmin.f32 %v282_v47, %v291_v49 }
 0x195   : > { %v285_v52 = vpop.permute.xlu1 %284  ;;  %v295_v58 = vrot.slane %v293_v51, 7  ;;  %v306_v59 = vrot.slane %v293_v51, 1  ;;  %v317_v0 = vrot.slane %v293_v51, 6  ;;  %v328_v3 = vrot.slane %v293_v51, 2 }
 0x196   : > { %v290_v54 = vsel %vm283_vm5, %v285_v52, 1e+30 }
 0x197   : > { %v292_v55 = vmin.f32 %v281_v53, %v290_v54 }
 0x199   : > { %v294_v56 = vrot.slane %v292_v55, 7  ;;  %v305_v57 = vrot.slane %v292_v55, 1  ;;  %v316_v60 = vrot.slane %v292_v55, 6  ;;  %v327_v61 = vrot.slane %v292_v55, 2 }
 0x19b   : > { %v297_v62 = vsel %vm296_vm6, %v294_v56, %v295_v58  ;;  %v309_v63 = vsel %vm307_vm7, %v306_v59, %v305_v57  ;;  %v298_v4 = vsel %vm296_vm6, %v295_v58, %v294_v56  ;;  %v331_v7 = vsel %vm329_vm11, %v328_v3, %v327_v61 }
 0x19c   : > { %v304_v1 = vmin.f32 %v293_v51, %v297_v62  ;;  %v313_v2 = vsel %vm311_vm8, %v309_v63, 1e+30  ;;  %v301_v5 = vsel %vm299_vm10, %v298_v4, 1e+30  ;;  %v320_v9 = vsel %vm318_vm9, %v317_v0, %v316_v60 }
 0x19d   : > { %v303_v8 = vmin.f32 %v292_v55, %v301_v5  ;;  %v319_v10 = vsel %vm318_vm9, %v316_v60, %v317_v0  ;;  %v308_v11 = vsel %vm307_vm7, %v305_v57, %v306_v59  ;;  %v335_v14 = vsel %vm333_vm12, %v331_v7, 1e+30 }
 0x19e   : > { %v315_v6 = vmin.f32 %v304_v1, %v313_v2  ;;  %v323_v15 = vsel %vm321_vm13, %v320_v9, 1e+30  ;;  %v330_v18 = vsel %vm329_vm11, %v327_v61, %v328_v3 }
 0x19f   : > { %v314_v13 = vmin.f32 %v303_v8, %v308_v11 }
 0x1a0   : > { %v326_v12 = vmin.f32 %v315_v6, %v319_v10 }
 0x1a1   : > { %v325_v17 = vmin.f32 %v314_v13, %v323_v15 }
 0x1a2   : > { %v337_v16 = vmin.f32 %v326_v12, %v335_v14 }
 0x1a3   : > { %v336_v20 = vmin.f32 %v325_v17, %v330_v18 }
 0x1a4   : > { %v339_v19 = vadd.f32 1.0, %v337_v16 }
 0x1a5   : > { %v338_v22 = vadd.f32 1.0, %v336_v20 }
 0x1a6   : > { %v341_v21 = vmul.f32 0.5, %v339_v19 }
 0x1a7   : > { %v340_v24 = vmul.f32 0.5, %v338_v22 }
 0x1a8   : > { %v343_v23 = vmul.f32 255.0, %v341_v21 }
 0x1a9   : > { %v342_v26 = vmul.f32 255.0, %v340_v24 }
 0x1aa   : > { %v358_v25 = vsel %vm350_vm1, %v343_v23, -inf  ;;  %352 = vst.msk [vmem:[%s205_s8 + $0x8] sm:$0xff] %vm350_vm1, %v343_v23 }
 0x1ab   : > { %359 = vmax.xlane.f32.xlu1 %v358_v25  ;;  %v355_v27 = vsel %vm350_vm1, %v342_v26, -inf  ;;  %351 = vst.msk [vmem:[%s205_s8] sm:$0xff] %vm350_vm1, %v342_v26 }
 0x1ac   : > { %356 = vmax.xlane.f32.xlu0 %v355_v27 }
 0x21e   : > { %v360_v28 = vpop.xlane.xlu1 %359 }
 0x21f   : > { %v357_v29 = vpop.xlane.xlu0 %356 }
 0x220   : > { %v361_v30 = vmax.f32 %v357_v29, %v360_v28 }
 0x222   : > { %v362_v31 = vrot.slane %v361_v30, 4 }
 0x224   : > { %v363_v32 = vmax.f32 %v361_v30, %v362_v31 }
 0x226   : > { %v364_v33 = vrot.slane %v363_v32, 2 }
 0x228   : > { %v365_v34 = vmax.f32 %v363_v32, %v364_v33 }
 0x22a   : > { %v366_v35 = vrot.slane %v365_v34, 1 }
 0x22c   : > { %v367_v36 = vmax.f32 %v365_v34, %v366_v35 }
 0x22e   : > { %369 = vst.msk [vmem:[%s213_s11] sm:$0x1] %vm368_vm14, %v367_v36 }
 0x22f PF: > { %p14_p7 = scmp.ge.s32.totalorder %s676_s17, 4   ;;  %s780_s12 = smov %s617_s13 }
 0x230   : > { %s781_s13 = smov %s621_s14  ;;  %s782_s14 = smov %s686_s20 }
 0x231   : > { %s783_s15 = smov %s676_s17  ;;  %16 = sbr.rel (!%p14_p7) target bundleno = 3 (0x3), region = 90 }
 0x236   :  { %419 = vsyncpa [#allocation3], 1 }
 0x237   :  { %421 = vsyncpa [#allocation3 + $0x1], 1 }

</bundles_post_ra>
